<compile_context>
chip_gen: v6e
topology: v6e:2x2x1
jax: 0.10.0
libtpu: 0.0.40
codegen_flags: <defaults>
</compile_context>

<pallas_src>
import functools

import jax
import jax.numpy as jnp
from jax.experimental import pallas as pl
from jax.experimental.pallas import tpu as pltpu

_BN_EPS = 1e-5
_VMEM_LIMIT_BYTES = 48 * 1024 * 1024  # leave headroom under v7x's 64 MiB physical VMEM


def _round_up(n, m):
    return -(-n // m) * m


def _pad_width_to(x_nhwc, mult):
    """Zero-pad the width (axis=2) of an NHWC tensor up to a multiple of `mult`."""
    w = x_nhwc.shape[2]
    pad = _round_up(w, mult) - w
    if pad:
        x_nhwc = jnp.pad(x_nhwc, ((0, 0), (0, 0), (0, pad), (0, 0)))
    return x_nhwc


def _pick_num_row_tiles(ho):
    for n in (4, 3, 2):
        if ho % n == 0:
            return n
    return 1


# ----------------------------------------------------------------------------
# Kernel 1: fused 3x3 valid conv + BN + ReLU (cls & loc branch weights concatenated
# along N).  One batch element per grid step; 9 taps accumulated in-kernel.
# ----------------------------------------------------------------------------
def _conv3x3_bn_relu_kernel(x_ref, w_ref, s_ref, b_ref, o_ref):
    # x_ref : (H, Wp, Cin) bf16   (Wp % 8 == 0)
    # w_ref : (9, Cin, N)  bf16   tap-major (kh*3 + kw)
    # s_ref / b_ref : (1, N) f32  fused BN scale / shift
    # o_ref : (H-2, Wp, N) f32    columns >= Wp-2 are garbage (sliced off downstream)
    h, w_pad, cin = x_ref.shape
    n = w_ref.shape[-1]
    ho = h - 2
    # roll in f32 (unpacked sublanes); MXU operands are cast back to bf16 per window.
    x32 = x_ref[...].astype(jnp.float32)
    acc = jnp.zeros((ho * w_pad, n), jnp.float32)
    for dj in range(3):                                   # width tap -> sublane roll (XLU)
        x_dj = pltpu.roll(x32, shift=w_pad - dj, axis=1) if dj else x32
        for di in range(3):                               # height tap -> leading-axis slice
            win = x_dj[di:di + ho, :, :].reshape(ho * w_pad, cin)   # clean: w_pad % 8 == 0
            acc = acc + jnp.dot(win.astype(jnp.bfloat16), w_ref[di * 3 + dj],
                                preferred_element_type=jnp.float32)
    y = jnp.maximum(acc * s_ref[...] + b_ref[...], 0.0)
    o_ref[...] = y.reshape(ho, w_pad, n)
    # TODO(synk): on v5e with small hidden (N < 128), pad N to 128 for unmasked stores.


def conv3x3_bn_relu(x_nhwc_bf16, w9, scale2, shift2):
    B, H, Wp, C = x_nhwc_bf16.shape
    N = w9.shape[-1]
    Ho = H - 2
    return pl.pallas_call(
        _conv3x3_bn_relu_kernel,
        out_shape=jax.ShapeDtypeStruct((B, Ho, Wp, N), jnp.float32),
        grid=(B,),
        in_specs=[
            pl.BlockSpec((None, H, Wp, C), lambda b: (b, 0, 0, 0)),
            pl.BlockSpec((9, C, N), lambda b: (0, 0, 0)),
            pl.BlockSpec((1, N), lambda b: (0, 0)),
            pl.BlockSpec((1, N), lambda b: (0, 0)),
        ],
        out_specs=pl.BlockSpec((None, Ho, Wp, N), lambda b: (b, 0, 0, 0)),
        compiler_params=pltpu.CompilerParams(
            dimension_semantics=("parallel",),
            vmem_limit_bytes=_VMEM_LIMIT_BYTES),
    )(x_nhwc_bf16, w9, scale2, shift2)
    # TODO(synk): fuse the template/search (and same-channel level) conv calls into one
    # pallas_call via PrefetchScalarGridSpec branch-id indexing to amortize launch cost.


# ----------------------------------------------------------------------------
# Kernel 2: fused depthwise xcorr + full head (both branches), tiled over output rows.
#   grid = (B, n_row_tiles), both parallel.
# ----------------------------------------------------------------------------
def _xcorr_head_kernel(s_ref, k_ref, w1_ref, s1_ref, b1_ref, w2_ref, b2_ref, o_ref,
                       *, hk, wk, wk_stride, row_tile):
    # s_ref : (hs, ws_pad, c2) f32 search feature (one batch element; ws_pad % 8 == 0)
    # k_ref : (hk*wk_stride, c2) f32 template feature, taps flattened (row stride wk_stride)
    # w1_ref: (c2, 3H) bf16 block-diag [h1_cls | c1_cls | h1_loc];  s1/b1: (1, 3H) f32
    # w2_ref: (3H, 128) bf16 block-diag [h2_cls, c2_cls, h2_loc] zero-padded; b2: (1, 128)
    # o_ref : (row_tile*ws_pad, 128) f32 = [cls, cen, exp(loc0..3), 0...]
    rt = pl.program_id(1)
    ws_pad, c2 = s_ref.shape[1], s_ref.shape[2]
    rows = row_tile + hk - 1
    s_blk = s_ref[pl.ds(rt * row_tile, rows), :, :]        # dynamic leading-axis slice
    acc = jnp.zeros((row_tile, ws_pad, c2), jnp.float32)
    # TODO(synk): on v6e/v7x pack this MAC loop in bf16 (widen-accumulate) to halve VALU ops.
    for dj in range(wk):                                   # width tap -> sublane roll (XLU)
        s_dj = pltpu.roll(s_blk, shift=ws_pad - dj, axis=1) if dj else s_blk
        for di in range(hk):                               # height tap -> leading-axis slice
            k_tap = k_ref[pl.ds(di * wk_stride + dj, 1), :]            # (1, c2) vld
            acc = acc + s_dj[di:di + row_tile, :, :] * k_tap
    feat = acc.reshape(row_tile * ws_pad, c2)              # clean merge: ws_pad % 8 == 0
    h = jnp.dot(feat.astype(jnp.bfloat16), w1_ref[...], preferred_element_type=jnp.float32)
    h = jnp.maximum(h * s1_ref[...] + b1_ref[...], 0.0)
    y = jnp.dot(h.astype(jnp.bfloat16), w2_ref[...], preferred_element_type=jnp.float32)
    y = y + b2_ref[...]
    col = jax.lax.broadcasted_iota(jnp.int32, y.shape, 1)
    o_ref[...] = jnp.where((col >= 2) & (col < 6), jnp.exp(y), y)   # exp only on loc cols


def xcorr_head(sslab, kflat, lp, *, hk, wk, wk_stride, ho):
    B, hs, ws_pad, c2 = sslab.shape
    n_rt = _pick_num_row_tiles(ho)
    row_tile = ho // n_rt
    h3 = lp["w1"].shape[1]
    kern = functools.partial(_xcorr_head_kernel, hk=hk, wk=wk,
                             wk_stride=wk_stride, row_tile=row_tile)
    return pl.pallas_call(
        kern,
        out_shape=jax.ShapeDtypeStruct((B, ho * ws_pad, 128), jnp.float32),
        grid=(B, n_rt),
        in_specs=[
            pl.BlockSpec((None, hs, ws_pad, c2), lambda b, r: (b, 0, 0, 0)),
            pl.BlockSpec((None, hk * wk_stride, c2), lambda b, r: (b, 0, 0)),
            pl.BlockSpec((c2, h3), lambda b, r: (0, 0)),
            pl.BlockSpec((1, h3), lambda b, r: (0, 0)),
            pl.BlockSpec((1, h3), lambda b, r: (0, 0)),
            pl.BlockSpec((h3, 128), lambda b, r: (0, 0)),
            pl.BlockSpec((1, 128), lambda b, r: (0, 0)),
        ],
        out_specs=pl.BlockSpec((None, row_tile * ws_pad, 128), lambda b, r: (b, r, 0)),
        compiler_params=pltpu.CompilerParams(
            dimension_semantics=("parallel", "parallel"),
            vmem_limit_bytes=_VMEM_LIMIT_BYTES),
    )(sslab, kflat, lp["w1"], lp["scale1"], lp["shift1"], lp["w2"], lp["bias2"])


# ----------------------------------------------------------------------------
# Parameter construction (deterministic; per-branch params, then fused forms).
# ----------------------------------------------------------------------------
def init_dwxcorr(key, in_c, hidden, out_c, with_cen):
    ks = jax.random.split(key, 8)
    std = 0.05
    bn_scale = jnp.full((hidden,), 1.0 / jnp.sqrt(1.0 + _BN_EPS), jnp.float32)
    bn_shift = jnp.zeros((hidden,), jnp.float32)
    p = {
        "ck_w": jax.random.normal(ks[0], (9, in_c, hidden), jnp.float32) * std,
        "cs_w": jax.random.normal(ks[1], (9, in_c, hidden), jnp.float32) * std,
        "ck_scale": bn_scale, "ck_shift": bn_shift,
        "cs_scale": bn_scale, "cs_shift": bn_shift,
        "h1_w": jax.random.normal(ks[2], (hidden, hidden), jnp.float32) * std,
        "h1_scale": bn_scale, "h1_shift": bn_shift,
        "h2_w": jax.random.normal(ks[3], (hidden, out_c), jnp.float32) * std,
        "h2_b": jax.random.normal(ks[4], (out_c,), jnp.float32) * std,
    }
    if with_cen:
        p.update({
            "c1_w": jax.random.normal(ks[5], (hidden, hidden), jnp.float32) * std,
            "c1_scale": bn_scale, "c1_shift": bn_shift,
            "c2_w": jax.random.normal(ks[6], (hidden, 1), jnp.float32) * std,
            "c2_b": jax.random.normal(ks[7], (1,), jnp.float32) * std,
        })
    return p


def _fuse_level(cls_p, loc_p, hidden):
    """Fused, kernel-ready weights (built once at init)."""
    H = hidden
    zHH = jnp.zeros((H, H), jnp.float32)
    z1 = jnp.zeros((H, 1), jnp.float32)
    z4 = jnp.zeros((H, 4), jnp.float32)
    w2 = jnp.block([[cls_p["h2_w"], z1, z4],
                    [z1, cls_p["c2_w"], z4],
                    [z1, z1, loc_p["h2_w"]]])                                   # (3H, 6)
    bias2 = jnp.concatenate([cls_p["h2_b"], cls_p["c2_b"], loc_p["h2_b"]])      # (6,)
    return {
        # 3x3 convs: cls & loc branch weights concatenated along N, stored bf16.
        "conv_k_w": jnp.concatenate([cls_p["ck_w"], loc_p["ck_w"]], axis=-1).astype(jnp.bfloat16),
        "conv_k_scale": jnp.concatenate([cls_p["ck_scale"], loc_p["ck_scale"]]).reshape(1, -1),
        "conv_k_shift": jnp.concatenate([cls_p["ck_shift"], loc_p["ck_shift"]]).reshape(1, -1),
        "conv_s_w": jnp.concatenate([cls_p["cs_w"], loc_p["cs_w"]], axis=-1).astype(jnp.bfloat16),
        "conv_s_scale": jnp.concatenate([cls_p["cs_scale"], loc_p["cs_scale"]]).reshape(1, -1),
        "conv_s_shift": jnp.concatenate([cls_p["cs_shift"], loc_p["cs_shift"]]).reshape(1, -1),
        # head first layer: block-diag (2H, 3H) = [[h1_cls, c1_cls, 0], [0, 0, h1_loc]]
        "w1": jnp.block([[cls_p["h1_w"], cls_p["c1_w"], zHH],
                         [zHH, zHH, loc_p["h1_w"]]]).astype(jnp.bfloat16),
        "scale1": jnp.concatenate([cls_p["h1_scale"], cls_p["c1_scale"],
                                   loc_p["h1_scale"]]).reshape(1, -1),
        "shift1": jnp.concatenate([cls_p["h1_shift"], cls_p["c1_shift"],
                                   loc_p["h1_shift"]]).reshape(1, -1),
        # head second layer: (3H, 6) zero-padded to 128 lanes -> unmasked, lane-dense store
        "w2": jnp.pad(w2, ((0, 0), (0, 128 - 6))).astype(jnp.bfloat16),
        "bias2": jnp.pad(bias2, (0, 128 - 6)).reshape(1, -1),
        "hidden": hidden,
    }


def init_multi_fcos(key, in_channels, weighted=False):
    params = {"levels": [], "weighted": weighted}
    keys = jax.random.split(key, len(in_channels))
    for i, c in enumerate(in_channels):
        kc, kl = jax.random.split(keys[i])
        cls_p = init_dwxcorr(kc, c, c, 1, with_cen=True)   # DepthwiseXCorr(c, c, 1, Center_ness=True)
        loc_p = init_dwxcorr(kl, c, c, 4, with_cen=False)  # DepthwiseXCorr(c, c, 4)
        params["levels"].append(_fuse_level(cls_p, loc_p, c))
    if weighted:
        params["cls_weight"] = jnp.ones((len(in_channels),), jnp.float32)
        params["cen_weight"] = jnp.ones((len(in_channels),), jnp.float32)
        params["loc_weight"] = jnp.ones((len(in_channels),), jnp.float32)
    return params


# ----------------------------------------------------------------------------
# Forward passes
# ----------------------------------------------------------------------------
def dwfcos_level_forward(lp, z_nchw, x_nchw):
    """One DepthwiseFCOS level; returns (B, Ho, Wo, 6) channels-last output."""
    z = jnp.transpose(z_nchw, (0, 2, 3, 1))                # NCHW -> NHWC once
    x = jnp.transpose(x_nchw, (0, 2, 3, 1))
    B, Hz, Wz, _ = z.shape
    _, Hx, Wx, _ = x.shape
    c2 = lp["conv_k_w"].shape[-1]                          # 2 * hidden

    # bf16 storage/DMA for the conv activations (MXU operands); width padded to 8-mult.
    z_p = _pad_width_to(z, 8).astype(jnp.bfloat16)
    x_p = _pad_width_to(x, 8).astype(jnp.bfloat16)

    kslab = conv3x3_bn_relu(z_p, lp["conv_k_w"], lp["conv_k_scale"], lp["conv_k_shift"])
    sslab = conv3x3_bn_relu(x_p, lp["conv_s_w"], lp["conv_s_scale"], lp["conv_s_shift"])

    hk, wk = Hz - 2, Wz - 2                                # valid template-feature size
    wk_stride = kslab.shape[2]                             # padded template width
    kflat = kslab.reshape(B, kslab.shape[1] * wk_stride, c2)

    hs, ws = Hx - 2, Wx - 2                                # valid search-feature size
    ho, wo = hs - hk + 1, ws - wk + 1
    ws_pad = sslab.shape[2]

    out = xcorr_head(sslab, kflat, lp, hk=hk, wk=wk, wk_stride=wk_stride, ho=ho)
    out = out.reshape(B, ho, ws_pad, 128)[:, :, :wo, :6]   # drop width/lane padding
    return out, (ho, wo)


def multi_fcos_forward(params, z_fs, x_fs):
    """z_fs / x_fs: lists of NCHW arrays. Returns (cls, cen, loc) in NCHW."""
    outs = []
    for lp, z, x in zip(params["levels"], z_fs, x_fs):
        o, _ = dwfcos_level_forward(lp, z, x)              # (B, Ho, Wo, 6)
        outs.append(o)
    L = len(outs)
    if params["weighted"]:
        cls_w = jax.nn.softmax(params["cls_weight"])
        cen_w = jax.nn.softmax(params["cen_weight"])
        loc_w = jax.nn.softmax(params["loc_weight"])
    else:
        cls_w = cen_w = loc_w = jnp.full((L,), 1.0 / L, jnp.float32)
    # weighted level-combine in plain XLA (tiny tensors), channels-last
    w6 = jnp.stack([cls_w, cen_w, loc_w, loc_w, loc_w, loc_w], axis=-1)   # (L, 6)
    stacked = jnp.stack(outs, axis=0)                                      # (L, B, Ho, Wo, 6)
    combined = jnp.einsum("lbhwc,lc->bhwc", stacked, w6)                   # (B, Ho, Wo, 6)
    nchw = jnp.transpose(combined, (0, 3, 1, 2))                           # single final transpose
    return nchw[:, 0:1], nchw[:, 1:2], nchw[:, 2:6]


# ----------------------------------------------------------------------------
# Demo
# ----------------------------------------------------------------------------
if __name__ == "__main__":
    key = jax.random.PRNGKey(0)
    in_channels = [32, 32]            # two pyramid levels, small channel count
    B, Hz, Hx = 2, 8, 16              # template 8x8, search 16x16

    kp, kz, kx = jax.random.split(key, 3)
    params = init_multi_fcos(kp, in_channels, weighted=False)

    zkeys = jax.random.split(kz, len(in_channels))
    xkeys = jax.random.split(kx, len(in_channels))
    z_fs = [jax.random.normal(zkeys[i], (B, c, Hz, Hz), jnp.float32)
            for i, c in enumerate(in_channels)]
    x_fs = [jax.random.normal(xkeys[i], (B, c, Hx, Hx), jnp.float32)
            for i, c in enumerate(in_channels)]

    cls, cen, loc = multi_fcos_forward(params, z_fs, x_fs)
    jax.block_until_ready((cls, cen, loc))

    # sanity: output shapes (NCHW) — xcorr spatial = (16-2) - (8-2) + 1 = 9
    assert cls.shape == (B, 1, 9, 9), cls.shape
    assert cen.shape == (B, 1, 9, 9), cen.shape
    assert loc.shape == (B, 4, 9, 9), loc.shape
    assert bool(jnp.all(loc > 0.0))          # loc = exp(...) must be positive
    assert bool(jnp.all(jnp.isfinite(cls))) and bool(jnp.all(jnp.isfinite(loc)))
    assert bool(jnp.all(jnp.isfinite(cen)))

    print("KERNEL_OK")
</pallas_src>

<mosaic_0001>
module attributes {stable_mosaic.version = 11 : i64} {
  func.func @_conv3x3_bn_relu_kernel(%arg0: i32, %arg1: memref<1x8x8x32xbf16, #tpu.memory_space<vmem>>, %arg2: memref<9x32x64xbf16, #tpu.memory_space<vmem>>, %arg3: memref<1x64xf32, #tpu.memory_space<vmem>>, %arg4: memref<1x64xf32, #tpu.memory_space<vmem>>, %arg5: memref<1x6x8x64xf32, #tpu.memory_space<vmem>>) attributes {dimension_semantics = [#tpu.dimension_semantics<parallel>], iteration_bounds = array<i64: 2>, scalar_prefetch = 0 : i64, scratch_operands = 0 : i64, tpu.core_type = #tpu.core_type<tc>, window_params = [{transform_indices = @transform_0, window_bounds = array<i64: 1, 8, 8, 32>}, {pipeline_mode = #tpu.pipeline_mode<synchronous>, transform_indices = @transform_1, window_bounds = array<i64: 9, 32, 64>}, {pipeline_mode = #tpu.pipeline_mode<synchronous>, transform_indices = @transform_2, window_bounds = array<i64: 1, 64>}, {pipeline_mode = #tpu.pipeline_mode<synchronous>, transform_indices = @transform_3, window_bounds = array<i64: 1, 64>}, {transform_indices = @transform_4, window_bounds = array<i64: 1, 6, 8, 64>}]} {
    %c0 = arith.constant 0 : index
    %c0_0 = arith.constant 0 : index
    %c0_1 = arith.constant 0 : index
    %c0_2 = arith.constant 0 : index
    %0 = vector.load %arg1[%c0, %c0_0, %c0_1, %c0_2] : memref<1x8x8x32xbf16, #tpu.memory_space<vmem>>, vector<1x8x8x32xbf16>
    %1 = vector.shape_cast %0 : vector<1x8x8x32xbf16> to vector<8x8x32xbf16>
    %2 = arith.extf %1 : vector<8x8x32xbf16> to vector<8x8x32xf32>
    %cst = arith.constant 0.000000e+00 : f32
    %3 = vector.broadcast %cst : f32 to vector<48x64xf32>
    %4 = vector.extract_strided_slice %2 {offsets = [0, 0, 0], sizes = [6, 8, 32], strides = [1, 1, 1]} : vector<8x8x32xf32> to vector<6x8x32xf32>
    %5 = vector.shape_cast %4 : vector<6x8x32xf32> to vector<48x32xf32>
    %6 = arith.truncf %5 : vector<48x32xf32> to vector<48x32xbf16>
    %c0_3 = arith.constant 0 : index
    %c0_4 = arith.constant 0 : index
    %c0_5 = arith.constant 0 : index
    %7 = vector.load %arg2[%c0_3, %c0_4, %c0_5] : memref<9x32x64xbf16, #tpu.memory_space<vmem>>, vector<1x32x64xbf16>
    %8 = vector.shape_cast %7 : vector<1x32x64xbf16> to vector<32x64xbf16>
    %cst_6 = arith.constant dense<0.000000e+00> : vector<48x64xf32>
    %9 = tpu.matmul %6, %8, %cst_6 {dimension_numbers = #tpu.dot_dimension_numbers<[1], [0], [0], [1], [0, 0, 1, 1], [], []>} : vector<48x32xbf16>, vector<32x64xbf16>, vector<48x64xf32> -> vector<48x64xf32>
    %10 = arith.addf %3, %9 : vector<48x64xf32>
    %11 = vector.extract_strided_slice %2 {offsets = [1, 0, 0], sizes = [6, 8, 32], strides = [1, 1, 1]} : vector<8x8x32xf32> to vector<6x8x32xf32>
    %12 = vector.shape_cast %11 : vector<6x8x32xf32> to vector<48x32xf32>
    %13 = arith.truncf %12 : vector<48x32xf32> to vector<48x32xbf16>
    %c3 = arith.constant 3 : index
    %c0_7 = arith.constant 0 : index
    %c0_8 = arith.constant 0 : index
    %14 = vector.load %arg2[%c3, %c0_7, %c0_8] : memref<9x32x64xbf16, #tpu.memory_space<vmem>>, vector<1x32x64xbf16>
    %15 = vector.shape_cast %14 : vector<1x32x64xbf16> to vector<32x64xbf16>
    %cst_9 = arith.constant dense<0.000000e+00> : vector<48x64xf32>
    %16 = tpu.matmul %13, %15, %cst_9 {dimension_numbers = #tpu.dot_dimension_numbers<[1], [0], [0], [1], [0, 0, 1, 1], [], []>} : vector<48x32xbf16>, vector<32x64xbf16>, vector<48x64xf32> -> vector<48x64xf32>
    %17 = arith.addf %10, %16 : vector<48x64xf32>
    %18 = vector.extract_strided_slice %2 {offsets = [2, 0, 0], sizes = [6, 8, 32], strides = [1, 1, 1]} : vector<8x8x32xf32> to vector<6x8x32xf32>
    %19 = vector.shape_cast %18 : vector<6x8x32xf32> to vector<48x32xf32>
    %20 = arith.truncf %19 : vector<48x32xf32> to vector<48x32xbf16>
    %c6 = arith.constant 6 : index
    %c0_10 = arith.constant 0 : index
    %c0_11 = arith.constant 0 : index
    %21 = vector.load %arg2[%c6, %c0_10, %c0_11] : memref<9x32x64xbf16, #tpu.memory_space<vmem>>, vector<1x32x64xbf16>
    %22 = vector.shape_cast %21 : vector<1x32x64xbf16> to vector<32x64xbf16>
    %cst_12 = arith.constant dense<0.000000e+00> : vector<48x64xf32>
    %23 = tpu.matmul %20, %22, %cst_12 {dimension_numbers = #tpu.dot_dimension_numbers<[1], [0], [0], [1], [0, 0, 1, 1], [], []>} : vector<48x32xbf16>, vector<32x64xbf16>, vector<48x64xf32> -> vector<48x64xf32>
    %24 = arith.addf %17, %23 : vector<48x64xf32>
    %c7_i32 = arith.constant 7 : i32
    %25 = tpu.dynamic_rotate %2 by %c7_i32 dim 1 : vector<8x8x32xf32>, i32 -> vector<8x8x32xf32>
    %26 = vector.extract_strided_slice %25 {offsets = [0, 0, 0], sizes = [6, 8, 32], strides = [1, 1, 1]} : vector<8x8x32xf32> to vector<6x8x32xf32>
    %27 = vector.shape_cast %26 : vector<6x8x32xf32> to vector<48x32xf32>
    %28 = arith.truncf %27 : vector<48x32xf32> to vector<48x32xbf16>
    %c1 = arith.constant 1 : index
    %c0_13 = arith.constant 0 : index
    %c0_14 = arith.constant 0 : index
    %29 = vector.load %arg2[%c1, %c0_13, %c0_14] : memref<9x32x64xbf16, #tpu.memory_space<vmem>>, vector<1x32x64xbf16>
    %30 = vector.shape_cast %29 : vector<1x32x64xbf16> to vector<32x64xbf16>
    %cst_15 = arith.constant dense<0.000000e+00> : vector<48x64xf32>
    %31 = tpu.matmul %28, %30, %cst_15 {dimension_numbers = #tpu.dot_dimension_numbers<[1], [0], [0], [1], [0, 0, 1, 1], [], []>} : vector<48x32xbf16>, vector<32x64xbf16>, vector<48x64xf32> -> vector<48x64xf32>
    %32 = arith.addf %24, %31 : vector<48x64xf32>
    %33 = vector.extract_strided_slice %25 {offsets = [1, 0, 0], sizes = [6, 8, 32], strides = [1, 1, 1]} : vector<8x8x32xf32> to vector<6x8x32xf32>
    %34 = vector.shape_cast %33 : vector<6x8x32xf32> to vector<48x32xf32>
    %35 = arith.truncf %34 : vector<48x32xf32> to vector<48x32xbf16>
    %c4 = arith.constant 4 : index
    %c0_16 = arith.constant 0 : index
    %c0_17 = arith.constant 0 : index
    %36 = vector.load %arg2[%c4, %c0_16, %c0_17] : memref<9x32x64xbf16, #tpu.memory_space<vmem>>, vector<1x32x64xbf16>
    %37 = vector.shape_cast %36 : vector<1x32x64xbf16> to vector<32x64xbf16>
    %cst_18 = arith.constant dense<0.000000e+00> : vector<48x64xf32>
    %38 = tpu.matmul %35, %37, %cst_18 {dimension_numbers = #tpu.dot_dimension_numbers<[1], [0], [0], [1], [0, 0, 1, 1], [], []>} : vector<48x32xbf16>, vector<32x64xbf16>, vector<48x64xf32> -> vector<48x64xf32>
    %39 = arith.addf %32, %38 : vector<48x64xf32>
    %40 = vector.extract_strided_slice %25 {offsets = [2, 0, 0], sizes = [6, 8, 32], strides = [1, 1, 1]} : vector<8x8x32xf32> to vector<6x8x32xf32>
    %41 = vector.shape_cast %40 : vector<6x8x32xf32> to vector<48x32xf32>
    %42 = arith.truncf %41 : vector<48x32xf32> to vector<48x32xbf16>
    %c7 = arith.constant 7 : index
    %c0_19 = arith.constant 0 : index
    %c0_20 = arith.constant 0 : index
    %43 = vector.load %arg2[%c7, %c0_19, %c0_20] : memref<9x32x64xbf16, #tpu.memory_space<vmem>>, vector<1x32x64xbf16>
    %44 = vector.shape_cast %43 : vector<1x32x64xbf16> to vector<32x64xbf16>
    %cst_21 = arith.constant dense<0.000000e+00> : vector<48x64xf32>
    %45 = tpu.matmul %42, %44, %cst_21 {dimension_numbers = #tpu.dot_dimension_numbers<[1], [0], [0], [1], [0, 0, 1, 1], [], []>} : vector<48x32xbf16>, vector<32x64xbf16>, vector<48x64xf32> -> vector<48x64xf32>
    %46 = arith.addf %39, %45 : vector<48x64xf32>
    %c6_i32 = arith.constant 6 : i32
    %47 = tpu.dynamic_rotate %2 by %c6_i32 dim 1 : vector<8x8x32xf32>, i32 -> vector<8x8x32xf32>
    %48 = vector.extract_strided_slice %47 {offsets = [0, 0, 0], sizes = [6, 8, 32], strides = [1, 1, 1]} : vector<8x8x32xf32> to vector<6x8x32xf32>
    %49 = vector.shape_cast %48 : vector<6x8x32xf32> to vector<48x32xf32>
    %50 = arith.truncf %49 : vector<48x32xf32> to vector<48x32xbf16>
    %c2 = arith.constant 2 : index
    %c0_22 = arith.constant 0 : index
    %c0_23 = arith.constant 0 : index
    %51 = vector.load %arg2[%c2, %c0_22, %c0_23] : memref<9x32x64xbf16, #tpu.memory_space<vmem>>, vector<1x32x64xbf16>
    %52 = vector.shape_cast %51 : vector<1x32x64xbf16> to vector<32x64xbf16>
    %cst_24 = arith.constant dense<0.000000e+00> : vector<48x64xf32>
    %53 = tpu.matmul %50, %52, %cst_24 {dimension_numbers = #tpu.dot_dimension_numbers<[1], [0], [0], [1], [0, 0, 1, 1], [], []>} : vector<48x32xbf16>, vector<32x64xbf16>, vector<48x64xf32> -> vector<48x64xf32>
    %54 = arith.addf %46, %53 : vector<48x64xf32>
    %55 = vector.extract_strided_slice %47 {offsets = [1, 0, 0], sizes = [6, 8, 32], strides = [1, 1, 1]} : vector<8x8x32xf32> to vector<6x8x32xf32>
    %56 = vector.shape_cast %55 : vector<6x8x32xf32> to vector<48x32xf32>
    %57 = arith.truncf %56 : vector<48x32xf32> to vector<48x32xbf16>
    %c5 = arith.constant 5 : index
    %c0_25 = arith.constant 0 : index
    %c0_26 = arith.constant 0 : index
    %58 = vector.load %arg2[%c5, %c0_25, %c0_26] : memref<9x32x64xbf16, #tpu.memory_space<vmem>>, vector<1x32x64xbf16>
    %59 = vector.shape_cast %58 : vector<1x32x64xbf16> to vector<32x64xbf16>
    %cst_27 = arith.constant dense<0.000000e+00> : vector<48x64xf32>
    %60 = tpu.matmul %57, %59, %cst_27 {dimension_numbers = #tpu.dot_dimension_numbers<[1], [0], [0], [1], [0, 0, 1, 1], [], []>} : vector<48x32xbf16>, vector<32x64xbf16>, vector<48x64xf32> -> vector<48x64xf32>
    %61 = arith.addf %54, %60 : vector<48x64xf32>
    %62 = vector.extract_strided_slice %47 {offsets = [2, 0, 0], sizes = [6, 8, 32], strides = [1, 1, 1]} : vector<8x8x32xf32> to vector<6x8x32xf32>
    %63 = vector.shape_cast %62 : vector<6x8x32xf32> to vector<48x32xf32>
    %64 = arith.truncf %63 : vector<48x32xf32> to vector<48x32xbf16>
    %c8 = arith.constant 8 : index
    %c0_28 = arith.constant 0 : index
    %c0_29 = arith.constant 0 : index
    %65 = vector.load %arg2[%c8, %c0_28, %c0_29] : memref<9x32x64xbf16, #tpu.memory_space<vmem>>, vector<1x32x64xbf16>
    %66 = vector.shape_cast %65 : vector<1x32x64xbf16> to vector<32x64xbf16>
    %cst_30 = arith.constant dense<0.000000e+00> : vector<48x64xf32>
    %67 = tpu.matmul %64, %66, %cst_30 {dimension_numbers = #tpu.dot_dimension_numbers<[1], [0], [0], [1], [0, 0, 1, 1], [], []>} : vector<48x32xbf16>, vector<32x64xbf16>, vector<48x64xf32> -> vector<48x64xf32>
    %68 = arith.addf %61, %67 : vector<48x64xf32>
    %c0_31 = arith.constant 0 : index
    %c0_32 = arith.constant 0 : index
    %69 = vector.load %arg3[%c0_31, %c0_32] : memref<1x64xf32, #tpu.memory_space<vmem>>, vector<1x64xf32>
    %70 = vector.broadcast %69 : vector<1x64xf32> to vector<48x64xf32>
    %71 = arith.mulf %68, %70 : vector<48x64xf32>
    %c0_33 = arith.constant 0 : index
    %c0_34 = arith.constant 0 : index
    %72 = vector.load %arg4[%c0_33, %c0_34] : memref<1x64xf32, #tpu.memory_space<vmem>>, vector<1x64xf32>
    %73 = vector.broadcast %72 : vector<1x64xf32> to vector<48x64xf32>
    %74 = arith.addf %71, %73 : vector<48x64xf32>
    %cst_35 = arith.constant 0.000000e+00 : f32
    %75 = vector.broadcast %cst_35 : f32 to vector<48x64xf32>
    %76 = arith.maximumf %74, %75 : vector<48x64xf32>
    %77 = vector.shape_cast %76 : vector<48x64xf32> to vector<6x8x64xf32>
    %c0_36 = arith.constant 0 : index
    %c0_37 = arith.constant 0 : index
    %c0_38 = arith.constant 0 : index
    %c0_39 = arith.constant 0 : index
    %78 = vector.load %arg5[%c0_36, %c0_37, %c0_38, %c0_39] : memref<1x6x8x64xf32, #tpu.memory_space<vmem>>, vector<1x6x8x64xf32>
    %79 = vector.shape_cast %78 : vector<1x6x8x64xf32> to vector<6x8x64xf32>
    %80 = vector.shape_cast %77 : vector<6x8x64xf32> to vector<1x6x8x64xf32>
    tpu.vector_store %arg5[%c0_36, %c0_37, %c0_38, %c0_39], %80 {strides = array<i32>} : memref<1x6x8x64xf32, #tpu.memory_space<vmem>>, vector<1x6x8x64xf32>,
    return
  }
  func.func @transform_0(%arg0: i32) -> (i32, i32, i32, i32) {
    %c0_i32 = arith.constant 0 : i32
    %c0_i32_0 = arith.constant 0 : i32
    %c0_i32_1 = arith.constant 0 : i32
    %c0_i32_2 = arith.constant 0 : i32
    return %arg0, %c0_i32, %c0_i32_0, %c0_i32_1 : i32, i32, i32, i32
  }
  func.func @transform_1(%arg0: i32) -> (i32, i32, i32) {
    %c0_i32 = arith.constant 0 : i32
    %c0_i32_0 = arith.constant 0 : i32
    %c0_i32_1 = arith.constant 0 : i32
    %c0_i32_2 = arith.constant 0 : i32
    return %c0_i32, %c0_i32_0, %c0_i32_1 : i32, i32, i32
  }
  func.func @transform_2(%arg0: i32) -> (i32, i32) {
    %c0_i32 = arith.constant 0 : i32
    %c0_i32_0 = arith.constant 0 : i32
    %c0_i32_1 = arith.constant 0 : i32
    return %c0_i32, %c0_i32_0 : i32, i32
  }
  func.func @transform_3(%arg0: i32) -> (i32, i32) {
    %c0_i32 = arith.constant 0 : i32
    %c0_i32_0 = arith.constant 0 : i32
    %c0_i32_1 = arith.constant 0 : i32
    return %c0_i32, %c0_i32_0 : i32, i32
  }
  func.func @transform_4(%arg0: i32) -> (i32, i32, i32, i32) {
    %c0_i32 = arith.constant 0 : i32
    %c0_i32_0 = arith.constant 0 : i32
    %c0_i32_1 = arith.constant 0 : i32
    %c0_i32_2 = arith.constant 0 : i32
    return %arg0, %c0_i32, %c0_i32_0, %c0_i32_1 : i32, i32, i32, i32
  }
}

</mosaic_0001>

<bundles_post_ra>
// kernel: tpu_custom_call.1
= control target key start
LH: loop header
LB: loop body
LE: loop exit
PB: predicated region body
PF: predicated region fallthrough
CT: control target
= control target key end

     0   :  { %9 = vsyncpa [#allocation3], 0  ;;  %s2114_s0 = inlined_call_operand.hbm [shape: bf16[2,8,8,32], index: 0, kind: input, shape index: {}]   ;;  %s2115_s1 = inlined_call_operand.hbm [shape: bf16[9,32,64], index: 1, kind: input, shape index: {}]   ;;  %s2116_s2 = inlined_call_operand.vmem [shape: f32[1,64], index: 2, kind: input, shape index: {}]   ;;  %s2117_s3 = inlined_call_operand.vmem [shape: f32[1,64], index: 3, kind: input, shape index: {}]   ;;  %s2118_s4 = inlined_call_operand.hbm [shape: f32[2,6,8,64], index: 4, kind: output, shape index: {}]  }
   0x1   :  { %11 = vsyncpa [#allocation3 + $0x1], 0 }
   0x2   :  { %12 = vsyncpa [#allocation6], 0 }
   0x3   :  { %13 = vsyncpa [#allocation4], 0 }
   0x4   :  { %15 = vsyncpa [#allocation4 + $0x1], 0  ;;  %s1701_s15 = smov 0   ;;  %s1703_s16 = smov 0  }
   0x5   :  { %s1705_s17 = smov 0   ;;  %s1707_s18 = smov 0  }
   0x6 LB: > { %s1722_s19 = sadd.s32 4294967295, %s1665_s18   ;;  %s1192_s20 = sadd.s32 4294967294, %s1665_s18   ;;  %s1665_s18 = sphi %s1707_s18, %s2140_s18   ;;  %s1661_s17 = sphi %s1705_s17, %s2139_s17   ;;  %s1657_s16 = sphi %s1703_s16, %s2138_s16   ;;  %s1653_s15 = sphi %s1701_s15, %s2137_s15  }
   0x7   : > { %p41_p0 = scmp.ne.s32.totalorder %s1657_s16, %s1653_s15  ;;  %p2119_p1 = scmp.eq.s32.totalorder %s1722_s19, 0 }
   0x8   : > { %p134_p3 = scmp.eq.s32.totalorder %s1192_s20, 1  ;;  %p1193_p5 = scmp.ge.s32.totalorder %s1665_s18, 1 }
   0x9   : > { %p1731_p4 = por %p2119_p1, %p41_p0  ;;  %p141_p7 = scmp.lt.s32.totalorder %s1665_s18, 3 }
   0xa   : > { %p1736_p6 = por %p134_p3, %p41_p0  ;;  %s1667_s24 = smov [#allocation5]  }
   0xb   : > { %s2123_s21 = scalar_select %p1731_p4, 1, 0 }
   0xc   : > { %s2124_s22 = scalar_select %p1736_p6, 1, 0 }
   0xd   : > { %p1741_p8 = pnand %p1193_p5, %p141_p7  ;;  %s153_s25 = sshll.u32 %s1667_s24, 4  ;;  %s154_s25 = int_to_ptr.vmem [resolvable:$true] %s153_s25 }
   0xe   : > { %s1755_s27 = sadd.s32 1, %s1665_s18   ;;  %s28_s28 = sadd.s32 1, %s1661_s17 }
   0xf   : > { %s2125_s23 = scalar_select %p1741_p8, 1, 0 }
  0x10   : > { %p1463_p9 = pneg %p1741_p8  ;;  %s25_s29 = ssub.s32 %s1665_s18, %s1755_s27 }
  0x11   : > { %s1554_s30 = scalar_lea.vmem %s154_s25, 2304  ;;  %p1562_p5 = scmp.lt.s32.totalorder %s154_s25, %s154_s25 }
  0x12   : > { %p1750_p11 = pnand %p1463_p9, %p2119_p1  ;;  %p1555_p13 = scmp.ne.s32.totalorder %s154_s25, %s1554_s30 }
  0x13   : > { %p1563_p7 = scmp.lt.s32.totalorder %s1554_s30, %s1554_s30 }
  0x14   : > { %p1545_p12 = pneg %p1750_p11 }
  0x15   : > { %p1564_p10 = por %p1563_p7, %p1562_p5 }
  0x16   : > { %p1557_p0 = pnand %p1555_p13, %p1545_p12 }
  0x18   : > { %p1558_p3 = pneg %p1557_p0 }
  0x1a   : > { %p1565_p2 = pnand %p1564_p10, %p1558_p3 }
  0x1c   : > { %1568 = shalt.err (!%p1565_p2)
}
  0x1d   : > { %s1668_s5 = smov 64   ;;  %s1669_s6 = smov 4  }
  0x1e   : > { %1466 = dma.hbm_to_vmem [thread:$0]  (!%p1750_p11), %s2115_s1, 2304, %s154_s25, [#allocation6], %s1668_s5, %s1668_s5, %s1669_s6  }
  0x1f   : > { %p26_p2 = scmp.eq.s32.totalorder %s25_s29, 0  ;;  %p35_p9 = scmp.ne.s32.totalorder %s1661_s17, %s1657_s16 }
  0x20   : > { %p36_p10 = scmp.eq.s32.totalorder %s1665_s18, 0  ;;  %p1476_p12 = scmp.lt.s32.totalorder %s1665_s18, 2 }
  0x21   : > { %s1775_s9 = scalar_select %p26_p2, %s1661_s17, %s28_s28  }
  0x22   : > { %p37_p13 = por %p36_p10, %p35_p9  ;;  %p2127_p0 = scmp.eq.s32.totalorder %s1722_s19, 1 }
  0x23   : > { %s173_s11 = sand.u32 1, %s1661_s17   ;;  %s1259_s12 = sshll.u32 %s1665_s18, 9 }
  0x24   : > { %p1779_p3 = por %p2127_p0, %p35_p9  ;;  %s1196_s13 = sshll.u32 %s173_s11, 5 }
  0x25   : > { %s1788_s24 = scalar_lea.hbm %s2114_s0, %s1259_s12  ;;  %s177_s25 = scalar_lea.vmem [#allocation2], %s1196_s13 }
  0x26   : > { %s2128_s10 = scalar_select %p1779_p3, 1, 0 }
  0x27   : > { %s184_s26 = sshll.u32 %s177_s25, 4  ;;  %p1790_p11 = pnand %p1476_p12, %p37_p13  ;;  %s1794_s26 = int_to_ptr.vmem [resolvable:$true] %s184_s26 }
  0x28   : > { %s1796_s29 = scalar_lea.sflag [#allocation3], %s173_s11  ;;  %s1569_s30 = scalar_lea.hbm %s1788_s24, 512 }
  0x29   : > { %p1570_p5 = scmp.ne.s32.totalorder %s1788_s24, %s1569_s30  ;;  %p1571_p7 = pneg %p1790_p11 }
  0x2a   : > { %s1574_s12 = scalar_lea.hbm %s2114_s0, 1024  ;;  %p1575_p10 = scmp.lt.s32.totalorder %s1788_s24, %s2114_s0 }
  0x2b   : > { %p1572_p2 = pnand %p1571_p7, %p1570_p5  ;;  %p1576_p12 = scmp.lt.s32.totalorder %s1574_s12, %s1569_s30 }
  0x2d   : > { %p1573_p9 = pneg %p1572_p2  ;;  %p1577_p13 = por %p1576_p12, %p1575_p10 }
  0x2f   : > { %p1578_p0 = pnand %p1577_p13, %p1573_p9 }
  0x31   : > { %1581 = shalt.err (!%p1578_p0)
}
  0x32   : > { %s1582_s11 = scalar_lea.vmem %s1794_s26, 512  ;;  %s1670_s20 = smov [#allocation2]  }
  0x33   : > { %p1583_p1 = scmp.ne.s32.totalorder %s1794_s26, %s1582_s11  ;;  %s1587_s25 = sshll.u32 %s1670_s20, 4  ;;  %s1588_s25 = int_to_ptr.vmem [resolvable:$false] %s1587_s25 }
  0x34   : > { %s1589_s7 = scalar_lea.vmem %s1588_s25, 1024  ;;  %p1590_p2 = scmp.lt.s32.totalorder %s1794_s26, %s1588_s25 }
  0x35   : > { %p1585_p6 = pnand %p1583_p1, %p1571_p7  ;;  %p1591_p3 = scmp.lt.s32.totalorder %s1589_s7, %s1582_s11 }
  0x37   : > { %p1586_p5 = pneg %p1585_p6  ;;  %p1592_p4 = por %p1591_p3, %p1590_p2 }
  0x39   : > { %p1593_p8 = pnand %p1592_p4, %p1586_p5 }
  0x3b   : > { %1596 = shalt.err (!%p1593_p8)
}
  0x3c   : > { %1470 = dma.hbm_to_vmem [thread:$0]  (!%p1790_p11), %s1788_s24, 512, %s1794_s26, %s1796_s29, %s1668_s5, %s1668_s5, %s1669_s6  }
  0x3d   : > { %p2130_p1 = scmp.ne.s32.totalorder %s2125_s23, 0 }
  0x3e   : > { %s1823_s30 = sand.u32 (!%p2130_p1), 1, %s1657_s16   ;;  %p2131_p4 = scmp.ne.s32.totalorder (!%p2130_p1), %s2123_s21, 0 }
  0x3f   : > { %196 = sbr.rel (%p2130_p1) target bundleno = 407 (0x197), region = 36  ;;  %s1200_s8 = sshll.u32 (!%p2130_p1), %s1823_s30, 5 }
  0x40   : > { %s199_s12 = scalar_lea.sflag (!%p2130_p1), [#allocation3], %s1823_s30  ;;  %s1827_s13 = scalar_lea.vmem (!%p2130_p1), [#allocation2], %s1200_s8 }
  0x44   : > { %1640 = dma.done.wait (%p2131_p4), %s199_s12, 512  }
  0x45   : > { %1642 = vsyncadd (%p2131_p4), %s199_s12, 4294966784  ;;  %p2132_p6 = scmp.eq.s32.totalorder %s1722_s19, 0 }
  0x47   : > { %1644 = dma.done.wait (%p2132_p6), [#allocation6], 2304   ;;  %p2133_p8 = pmov %p2132_p6 }
  0x48   : > { %v1671_v0 = vmov 0.0   ;;  %vm1672_vm0 = vmmov 0   ;;  %v1518_v1 = vld [vmem:[#allocation5 + $0x38] sm:$0xff]   ;;  %v1519_v2 = vld [vmem:[#allocation5 + $0x30] sm:$0xff]   ;;  %v1844_v3 = vld [vmem:[%s1827_s13 + $0xc] sm:$0xf] }
  0x49   : > { %1646 = vsyncadd (%p2133_p8), [#allocation6], 4294964992  ;;  %1449 = vmatprep.subr.bf16.mxu1 %v1671_v0  ;;  %1305 = vmatprep.subr.bf16.mxu0 %v1671_v0  ;;  %v1847_v4 = vld [vmem:[%s1827_s13 + $0x10] sm:$0xf]  ;;  %v1852_v5 = vld [vmem:[%s1827_s13 + $0x4] sm:$0xf]  ;;  %v243_v32 = vunpack.c.l.bf16 %v1844_v3 }
  0x4a   : > { %1313 = vmatprep.mubr.msk.bf16.mxu1 %vm1672_vm0, %v1671_v0  ;;  %1309 = vmatprep.mubr.msk.bf16.mxu0 %vm1672_vm0, %v1671_v0  ;;  %v1855_v6 = vld [vmem:[%s1827_s13 + $0x8] sm:$0xf]  ;;  %v1206_v7 = vcombine.low %v1844_v3, %v1847_v4  ;;  %vm275_vm1 = vcmask 261120   ;;  %v1864_v11 = vld [vmem:[%s1827_s13 + $0x14] sm:$0xf]  ;;  %v1526_v13 = vld [vmem:[#allocation5] sm:$0xff]   ;;  %v241_v25 = vunpack.c.l.bf16 %v1852_v5  ;;  %v244_v33 = vunpack.c.l.bf16 %v1847_v4 }
  0x4b   : > { %1451 = vmatpush3.bf16.msra.mxu1 %v1518_v1  ;;  %1306 = vmatpush3.bf16.msra.mxu0 %v1518_v1  ;;  %v1205_v8 = vcombine.low %v1852_v5, %v1855_v6  ;;  %v1521_v9 = vld [vmem:[#allocation5 + $0x8] sm:$0xff]   ;;  %v1867_v12 = vld [vmem:[%s1827_s13 + $0x18] sm:$0xf]  ;;  %v1527_v14 = vld [vmem:[#allocation5 + $0x60] sm:$0xff]   ;;  %v1203_v16 = vcombine.low %v1855_v6, %v1844_v3  ;;  %v1204_v21 = vcombine.low %v1847_v4, %v1864_v11  ;;  %v242_v26 = vunpack.c.l.bf16 %v1855_v6  ;;  %s1453_s5 = smul.u32 48, %s1823_s30  ;;  %p2134_p11 = scmp.ne.s32.totalorder %s2128_s10, 0 }
  0x4c   : > { %1450 = vmatprep.subr.bf16.mxu1 %v1671_v0  ;;  %1307 = vmatprep.subr.bf16.mxu0 %v1671_v0  ;;  %v1524_v10 = vld [vmem:[#allocation5 + $0x68] sm:$0xff]   ;;  %v1207_v15 = vcombine.low %v1864_v11, %v1867_v12  ;;  %v1884_v18 = vld [vmem:[%s1827_s13] sm:$0xf]  ;;  %v1529_v22 = vld [vmem:[#allocation5 + $0x18] sm:$0xff]   ;;  %v505_v28 = vrot.slane %v241_v25, 1  ;;  %v507_v36 = vrot.slane %v243_v32, 1  ;;  %v245_v41 = vunpack.c.l.bf16 %v1864_v11 }
  0x4d   : > { %v1530_v17 = vld [vmem:[#allocation5 + $0x48] sm:$0xff]   ;;  %v1534_v19 = vld [vmem:[#allocation5 + $0x40] sm:$0xff]   ;;  %v1202_v20 = vcombine.low %v1884_v18, %v1852_v5  ;;  %v1903_v23 = vld [vmem:[%s1827_s13 + $0x1c] sm:$0xf]  ;;  %v506_v29 = vrot.slane %v242_v26, 1  ;;  %v240_v30 = vunpack.c.l.bf16 %v1884_v18  ;;  %v508_v37 = vrot.slane %v244_v33, 1 }
  0x4e   : > { %v1533_v24 = vld [vmem:[#allocation5 + $0x10] sm:$0xff]   ;;  %v1218_v27 = vcombine.low %v1867_v12, %v1903_v23  ;;  %v1536_v34 = vld [vmem:[#allocation5 + $0x28] sm:$0xff]   ;;  %v1538_v38 = vld [vmem:[#allocation5 + $0x20] sm:$0xff]   ;;  %v246_v42 = vunpack.c.l.bf16 %v1867_v12  ;;  %v509_v44 = vrot.slane %v245_v41, 1  ;;  %v781_v50 = vrot.slane %v241_v25, 2  ;;  %s2037_s26 = scalar_lea.vmem [#allocation7], %s1453_s5 }
  0x4f   : > { %1452 = vmatpush3.bf16.msra.mxu1 %v1519_v2  ;;  %1308 = vmatpush3.bf16.msra.mxu0 %v1519_v2  ;;  %v604_v31 = vpack.c.bf16 %v506_v29, %v505_v28  ;;  %v504_v35 = vrot.slane %v240_v30, 1  ;;  %v605_v40 = vpack.c.bf16 %v508_v37, %v507_v36  ;;  %v1535_v43 = vld [vmem:[#allocation5 + $0x78] sm:$0xff]   ;;  %v1537_v46 = vld [vmem:[#allocation5 + $0x70] sm:$0xff]   ;;  %v513_v47 = vpack.c.bf16 %v507_v36, %v506_v29  ;;  %v1540_v53 = vld [vmem:[#allocation5 + $0x88] sm:$0xff]   ;;  %s1454_s28 = smul.u32 768, %s1722_s19  ;;  %s1109_s29 = sshll.u32 %s2037_s26, 4  ;;  %s2069_s29 = int_to_ptr.vmem [resolvable:$true] %s1109_s29 }
  0x50   : > { %1321 = vmatprep.subr.bf16.mxu1 %v1671_v0  ;;  %1337 = vmatprep.subr.bf16.mxu0 %v1671_v0  ;;  %v510_v45 = vrot.slane %v246_v42, 1  ;;  %v780_v49 = vrot.slane %v240_v30, 2  ;;  %v514_v52 = vpack.c.bf16 %v509_v44, %v508_v37  ;;  %v782_v54 = vrot.slane %v242_v26, 2  ;;  %v1542_v56 = vld [vmem:[#allocation5 + $0x80] sm:$0xff]   ;;  %v1539_v58 = vld [vmem:[#allocation5 + $0x58] sm:$0xff]   ;;  %v1541_v61 = vld [vmem:[#allocation5 + $0x50] sm:$0xff]  }
  0x51   : > { %v512_v39 = vpack.c.bf16 %v505_v28, %v504_v35  ;;  %v783_v55 = vrot.slane %v243_v32, 2  ;;  %v784_v59 = vrot.slane %v244_v33, 2  ;;  %v785_v60 = vrot.slane %v245_v41, 2  ;;  %s2067_s20 = scalar_lea.hbm %s2118_s4, %s1454_s28  ;;  %s1096_s19 = scalar_lea.sflag [#allocation4], %s1823_s30 }
  0x52   : > { %1314 = vmatmul.mubr.msk.bf16.vlgmr.msra.gmra.mxu1 %vm275_vm1, %v1206_v7  ;;  %1310 = vmatmul.mubr.msk.bf16.vlgmr.msra.gmra.mxu0 %vm275_vm1, %v1205_v8  ;;  %v606_v48 = vpack.c.bf16 %v510_v45, %v509_v44  ;;  %v788_v51 = vpack.c.bf16 %v781_v50, %v780_v49  ;;  %v247_v62 = vunpack.c.l.bf16 %v1903_v23  ;;  %v880_v3 = vpack.c.bf16 %v782_v54, %v781_v50  ;;  %s1597_s25 = scalar_lea.vmem %s2069_s29, 768  ;;  %s1673_s7 = smov [#allocation7]  }
  0x53   : > { %1322 = vmatpush3.bf16.msra.mxu1 %v1521_v9  ;;  %1338 = vmatpush3.bf16.msra.mxu0 %v1524_v10  ;;  %v789_v57 = vpack.c.bf16 %v783_v55, %v782_v54  ;;  %v790_v63 = vpack.c.bf16 %v785_v60, %v784_v59  ;;  %v786_v4 = vrot.slane %v246_v42, 2  ;;  %v881_v6 = vpack.c.bf16 %v784_v59, %v783_v55  ;;  %p1598_p3 = scmp.ne.s32.totalorder %s2069_s29, %s1597_s25  ;;  %s1601_s8 = sshll.u32 %s1673_s7, 4  ;;  %s1602_s8 = int_to_ptr.vmem [resolvable:$false] %s1601_s8 }
  0x54   : > { %1317 = vmatprep.mubr.msk.bf16.mxu1 %vm1672_vm0, %v1671_v0  ;;  %1323 = vmatprep.subr.bf16.mxu1 %v1671_v0  ;;  %v511_v1 = vrot.slane %v247_v62, 1  ;;  %v787_v5 = vrot.slane %v247_v62, 2  ;;  %vm1088_vm2 = vcmask 523264   ;;  %s1603_s12 = scalar_lea.vmem %s1602_s8, 1536  ;;  %p1604_p10 = scmp.lt.s32.totalorder %s2069_s29, %s1602_s8 }
  0x55   : > { %1339 = vmatprep.subr.bf16.mxu0 %v1671_v0  ;;  %1341 = vmatprep.mubr.msk.bf16.mxu0 %vm1672_vm0, %v1671_v0  ;;  %v882_v8 = vpack.c.bf16 %v786_v4, %v785_v60  ;;  %p1599_p7 = pnand %p1598_p3, %p2134_p11  ;;  %p1605_p12 = scmp.lt.s32.totalorder %s1603_s12, %s1597_s25 }
  0x56   : > { %v696_v2 = vpack.c.bf16 %v511_v1, %v510_v45  ;;  %v972_v7 = vpack.c.bf16 %v787_v5, %v786_v4 }
  0x57   : > { %1324 = vmatpush3.bf16.msra.mxu1 %v1526_v13  ;;  %1340 = vmatpush3.bf16.msra.mxu0 %v1527_v14  ;;  %p1600_p9 = pneg %p1599_p7  ;;  %p1606_p13 = por %p1605_p12, %p1604_p10 }
  0x58   : > { %1353 = vmatprep.subr.bf16.mxu1 %v1671_v0  ;;  %1369 = vmatprep.subr.bf16.mxu0 %v1671_v0 }
  0x59   : > { %p1607_p0 = pnand %p1606_p13, %p1600_p9 }
  0x5a   : > { %1318 = vmatmul.mubr.msk.bf16.gmra.mxu1 %vm275_vm1, %v1207_v15  ;;  %1342 = vmatmul.mubr.msk.bf16.vlgmr.msra.gmra.mxu0 %vm275_vm1, %v1203_v16 }
  0x5b   : > { %1325 = vmatprep.mubr.msk.bf16.mxu1 %vm1672_vm0, %v1671_v0  ;;  %1370 = vmatpush3.bf16.msra.mxu0 %v1530_v17 }
  0x5c   : > { %1345 = vmatprep.mubr.msk.bf16.mxu0 %vm1672_vm0, %v1671_v0  ;;  %1371 = vmatprep.subr.bf16.mxu0 %v1671_v0 }
  0x5f   : > { %1372 = vmatpush3.bf16.msra.mxu0 %v1534_v19 }
  0x60   : > { %1401 = vmatprep.subr.bf16.mxu0 %v1671_v0 }
  0x62   : > { %1326 = vmatmul.mubr.msk.bf16.vlgmr.msra.gmra.mxu1 %vm275_vm1, %v1202_v20  ;;  %1346 = vmatmul.mubr.msk.bf16.gmra.mxu0 %vm275_vm1, %v1204_v21 }
  0x63   : > { %1354 = vmatpush3.bf16.msra.mxu1 %v1529_v22  ;;  %1329 = vmatprep.mubr.msk.bf16.mxu1 %vm1672_vm0, %v1671_v0 }
  0x64   : > { %1349 = vmatprep.mubr.msk.bf16.mxu0 %vm1672_vm0, %v1671_v0  ;;  %1355 = vmatprep.subr.bf16.mxu1 %v1671_v0 }
  0x67   : > { %1356 = vmatpush3.bf16.msra.mxu1 %v1533_v24 }
  0x68   : > { %1385 = vmatprep.subr.bf16.mxu1 %v1671_v0 }
  0x6a   : > { %1330 = vmatmul.mubr.msk.bf16.gmra.mxu1 %vm275_vm1, %v1203_v16  ;;  %1350 = vmatmul.mubr.msk.bf16.gmra.mxu0 %vm275_vm1, %v1218_v27 }
  0x6b   : > { %1333 = vmatprep.mubr.msk.bf16.mxu1 %vm1672_vm0, %v1671_v0  ;;  %1373 = vmatprep.mubr.msk.bf16.mxu0 %vm1672_vm0, %v1671_v0 }
  0x72   : > { %1334 = vmatmul.mubr.msk.bf16.gmra.mxu1 %vm275_vm1, %v1204_v21  ;;  %1374 = vmatmul.mubr.msk.bf16.vlgmr.msra.gmra.mxu0 %vm275_vm1, %v604_v31 }
  0x73   : > { %1357 = vmatprep.mubr.msk.bf16.mxu1 %vm1672_vm0, %v1671_v0  ;;  %1402 = vmatpush3.bf16.msra.mxu0 %v1536_v34 }
  0x74   : > { %1377 = vmatprep.mubr.msk.bf16.mxu0 %vm1672_vm0, %v1671_v0  ;;  %1403 = vmatprep.subr.bf16.mxu0 %v1671_v0 }
  0x77   : > { %1404 = vmatpush3.bf16.msra.mxu0 %v1538_v38 }
  0x78   : > { %1433 = vmatprep.subr.bf16.mxu0 %v1671_v0 }
  0x7a   : > { %1358 = vmatmul.mubr.msk.bf16.vlgmr.msra.gmra.mxu1 %vm275_vm1, %v512_v39  ;;  %1378 = vmatmul.mubr.msk.bf16.gmra.mxu0 %vm275_vm1, %v605_v40 }
  0x7b   : > { %1386 = vmatpush3.bf16.msra.mxu1 %v1535_v43  ;;  %1361 = vmatprep.mubr.msk.bf16.mxu1 %vm1672_vm0, %v1671_v0 }
  0x7c   : > { %1381 = vmatprep.mubr.msk.bf16.mxu0 %vm1672_vm0, %v1671_v0  ;;  %1387 = vmatprep.subr.bf16.mxu1 %v1671_v0 }
  0x7f   : > { %1388 = vmatpush3.bf16.msra.mxu1 %v1537_v46 }
  0x80   : > { %1417 = vmatprep.subr.bf16.mxu1 %v1671_v0 }
  0x82   : > { %1362 = vmatmul.mubr.msk.bf16.gmra.mxu1 %vm275_vm1, %v513_v47  ;;  %1382 = vmatmul.mubr.msk.bf16.gmra.mxu0 %vm275_vm1, %v606_v48 }
  0x83   : > { %1365 = vmatprep.mubr.msk.bf16.mxu1 %vm1672_vm0, %v1671_v0  ;;  %1405 = vmatprep.mubr.msk.bf16.mxu0 %vm1672_vm0, %v1671_v0 }
  0x8a   : > { %1366 = vmatmul.mubr.msk.bf16.gmra.mxu1 %vm275_vm1, %v514_v52  ;;  %1406 = vmatmul.mubr.msk.bf16.vlgmr.msra.gmra.mxu0 %vm275_vm1, %v788_v51 }
  0x8b   : > { %1389 = vmatprep.mubr.msk.bf16.mxu1 %vm1672_vm0, %v1671_v0  ;;  %1434 = vmatpush3.bf16.msra.mxu0 %v1540_v53 }
  0x8c   : > { %1409 = vmatprep.mubr.msk.bf16.mxu0 %vm1672_vm0, %v1671_v0  ;;  %1435 = vmatprep.subr.bf16.mxu0 %v1671_v0 }
  0x8f   : > { %1436 = vmatpush3.bf16.msra.mxu0 %v1542_v56 }
  0x92   : > { %1390 = vmatmul.mubr.msk.bf16.vlgmr.msra.gmra.mxu1 %vm275_vm1, %v513_v47  ;;  %1410 = vmatmul.mubr.msk.bf16.gmra.mxu0 %vm275_vm1, %v789_v57 }
  0x93   : > { %1418 = vmatpush3.bf16.msra.mxu1 %v1539_v58  ;;  %1393 = vmatprep.mubr.msk.bf16.mxu1 %vm1672_vm0, %v1671_v0 }
  0x94   : > { %1413 = vmatprep.mubr.msk.bf16.mxu0 %vm1672_vm0, %v1671_v0  ;;  %1419 = vmatprep.subr.bf16.mxu1 %v1671_v0 }
  0x97   : > { %1420 = vmatpush3.bf16.msra.mxu1 %v1541_v61 }
  0x9a   : > { %1394 = vmatmul.mubr.msk.bf16.gmra.mxu1 %vm275_vm1, %v514_v52  ;;  %1414 = vmatmul.mubr.msk.bf16.gmra.mxu0 %vm275_vm1, %v790_v63 }
  0x9b   : > { %1397 = vmatprep.mubr.msk.bf16.mxu1 %vm1672_vm0, %v1671_v0  ;;  %1437 = vmatprep.mubr.msk.bf16.mxu0 %vm1672_vm0, %v1671_v0 }
  0xa2   : > { %1398 = vmatmul.mubr.msk.bf16.gmra.mxu1 %vm275_vm1, %v696_v2  ;;  %1438 = vmatmul.mubr.msk.bf16.vlgmr.msra.gmra.mxu0 %vm275_vm1, %v789_v57 }
  0xa3   : > { %1421 = vmatprep.mubr.msk.bf16.mxu1 %vm1672_vm0, %v1671_v0  ;;  %1441 = vmatprep.mubr.msk.bf16.mxu0 %vm1672_vm0, %v1671_v0 }
  0xaa   : > { %1422 = vmatmul.mubr.msk.bf16.vlgmr.msra.gmra.mxu1 %vm275_vm1, %v880_v3  ;;  %1442 = vmatmul.mubr.msk.bf16.gmra.mxu0 %vm275_vm1, %v790_v63 }
  0xab   : > { %1425 = vmatprep.mubr.msk.bf16.mxu1 %vm1672_vm0, %v1671_v0  ;;  %1445 = vmatprep.mubr.msk.bf16.mxu0 %vm1672_vm0, %v1671_v0 }
  0xb2   : > { %1426 = vmatmul.mubr.msk.bf16.gmra.mxu1 %vm275_vm1, %v881_v6  ;;  %1446 = vmatmul.mubr.msk.bf16.gmra.mxu0 %vm275_vm1, %v972_v7 }
  0xb3   : > { %1429 = vmatprep.mubr.msk.bf16.mxu1 %vm1672_vm0, %v1671_v0 }
  0xba   : > { %1430 = vmatmul.mubr.msk.bf16.gmra.mxu1 %vm275_vm1, %v882_v8 }
 0x112   : > { %v327_v9 = vpop.f32.mrf.mxu1  ;;  %v319_v10 = vpop.f32.mrf.mxu0 }
 0x114   : > { %v1315_v11 = vpop.f32.mrf.mxu1  ;;  %v1311_v12 = vpop.f32.mrf.mxu0 }
 0x116   : > { %v330_v13 = vpop.f32.mrf.mxu1  ;;  %v322_v14 = vpop.f32.mrf.mxu0 }
 0x118   : > { %v1316_v15 = vpop.f32.mrf.mxu1  ;;  %v1312_v16 = vpop.f32.mrf.mxu0 }
 0x11a   : > { %v335_v17 = vpop.f32.mrf.mxu1  ;;  %v475_v18 = vpop.f32.mrf.mxu0 }
 0x11c   : > { %v1319_v19 = vpop.f32.mrf.mxu1  ;;  %v1343_v20 = vpop.f32.mrf.mxu0 }
 0x11e   : > { %v338_v21 = vpop.f32.mrf.mxu1  ;;  %v478_v22 = vpop.f32.mrf.mxu0 }
 0x120   : > { %v1320_v23 = vpop.f32.mrf.mxu1  ;;  %v1344_v24 = vpop.f32.mrf.mxu0 }
 0x122   : > { %v397_v0 = vpop.f32.mrf.mxu1  ;;  %v483_v25 = vpop.f32.mrf.mxu0 }
 0x123   : > { %v398_v26 = vadd.f32 %v397_v0, %v319_v10 }
 0x124   : > { %v1327_v27 = vpop.f32.mrf.mxu1  ;;  %v1347_v28 = vpop.f32.mrf.mxu0 }
 0x125   : > { %v1988_v29 = vadd.f32 %v475_v18, %v398_v26 }
 0x126   : > { %v400_v30 = vpop.f32.mrf.mxu1  ;;  %v486_v31 = vpop.f32.mrf.mxu0 }
 0x127   : > { %v401_v32 = vadd.f32 %v400_v30, %v322_v14 }
 0x128   : > { %v1328_v33 = vpop.f32.mrf.mxu1  ;;  %v1348_v34 = vpop.f32.mrf.mxu0 }
 0x129   : > { %v1990_v35 = vadd.f32 %v478_v22, %v401_v32 }
 0x12a   : > { %v405_v36 = vpop.f32.mrf.mxu1  ;;  %v491_v37 = vpop.f32.mrf.mxu0 }
 0x12b   : > { %v406_v38 = vadd.f32 %v405_v36, %v327_v9 }
 0x12c   : > { %v1331_v39 = vpop.f32.mrf.mxu1  ;;  %v1351_v40 = vpop.f32.mrf.mxu0 }
 0x12d   : > { %v1992_v41 = vadd.f32 %v483_v25, %v406_v38 }
 0x12e   : > { %v408_v42 = vpop.f32.mrf.mxu1  ;;  %v494_v43 = vpop.f32.mrf.mxu0 }
 0x12f   : > { %v409_v44 = vadd.f32 %v408_v42, %v330_v13 }
 0x130   : > { %v1332_v45 = vpop.f32.mrf.mxu1  ;;  %v1352_v46 = vpop.f32.mrf.mxu0 }
 0x131   : > { %v1994_v47 = vadd.f32 %v486_v31, %v409_v44 }
 0x132   : > { %v413_v48 = vpop.f32.mrf.mxu1  ;;  %v667_v49 = vpop.f32.mrf.mxu0 }
 0x133   : > { %v414_v50 = vadd.f32 %v413_v48, %v335_v17 }
 0x134   : > { %v1335_v51 = vpop.f32.mrf.mxu1  ;;  %v1375_v52 = vpop.f32.mrf.mxu0 }
 0x135   : > { %v1996_v53 = vadd.f32 %v491_v37, %v414_v50 }
 0x136   : > { %v416_v54 = vpop.f32.mrf.mxu1  ;;  %v670_v55 = vpop.f32.mrf.mxu0 }
 0x137   : > { %v417_v56 = vadd.f32 %v416_v54, %v338_v21 }
 0x138   : > { %v1336_v57 = vpop.f32.mrf.mxu1  ;;  %v1376_v58 = vpop.f32.mrf.mxu0 }
 0x139   : > { %v1998_v59 = vadd.f32 %v494_v43, %v417_v56 }
 0x13a   : > { %v575_v60 = vpop.f32.mrf.mxu1  ;;  %v675_v61 = vpop.f32.mrf.mxu0 }
 0x13b   : > { %v598_v36 = vadd.f32 %v575_v60, %v1988_v29 }
 0x13c   : > { %v1359_v62 = vpop.f32.mrf.mxu1  ;;  %v1379_v63 = vpop.f32.mrf.mxu0 }
 0x13d   : > { %v690_v43 = vadd.f32 %v667_v49, %v598_v36  ;;  %v2021_v49 = vld [vmem:[%s2116_s2] ss:$0 sm:$0xff] }
 0x13e   : > { %v578_v1 = vpop.f32.mrf.mxu1  ;;  %v2000_v2 = vpop.f32.mrf.mxu0 }
 0x13f   : > { %v599_v42 = vadd.f32 %v578_v1, %v1990_v35 }
 0x140   : > { %v1360_v3 = vpop.f32.mrf.mxu1  ;;  %v1380_v4 = vpop.f32.mrf.mxu0 }
 0x141   : > { %v691_v52 = vadd.f32 %v670_v55, %v599_v42 }
 0x142   : > { %v583_v5 = vpop.f32.mrf.mxu1  ;;  %v2002_v6 = vpop.f32.mrf.mxu0 }
 0x143   : > { %v600_v51 = vadd.f32 %v583_v5, %v1992_v41 }
 0x144   : > { %v1363_v7 = vpop.f32.mrf.mxu1  ;;  %v1383_v8 = vpop.f32.mrf.mxu0 }
 0x145   : > { %v692_v63 = vadd.f32 %v675_v61, %v600_v51  ;;  %v2028_v7 = vld [vmem:[%s2117_s3] ss:$0 sm:$0xff] }
 0x146   : > { %v586_v9 = vpop.f32.mrf.mxu1  ;;  %v2004_v10 = vpop.f32.mrf.mxu0 }
 0x147   : > { %v601_v62 = vadd.f32 %v586_v9, %v1994_v47 }
 0x148   : > { %v1364_v11 = vpop.f32.mrf.mxu1  ;;  %v1384_v12 = vpop.f32.mrf.mxu0 }
 0x149   : > { %v693_v8 = vadd.f32 %v2000_v2, %v601_v62 }
 0x14a   : > { %v591_v13 = vpop.f32.mrf.mxu1  ;;  %v851_v14 = vpop.f32.mrf.mxu0 }
 0x14b   : > { %v602_v5 = vadd.f32 %v591_v13, %v1996_v53 }
 0x14c   : > { %v1367_v15 = vpop.f32.mrf.mxu1  ;;  %v1407_v16 = vpop.f32.mrf.mxu0 }
 0x14d   : > { %v694_v13 = vadd.f32 %v2002_v6, %v602_v5 }
 0x14e   : > { %v2006_v17 = vpop.f32.mrf.mxu1  ;;  %v854_v18 = vpop.f32.mrf.mxu0 }
 0x150   : > { %v1368_v19 = vpop.f32.mrf.mxu1  ;;  %v1408_v20 = vpop.f32.mrf.mxu0 }
 0x152   : > { %v751_v21 = vpop.f32.mrf.mxu1  ;;  %v859_v22 = vpop.f32.mrf.mxu0 }
 0x153   : > { %v774_v46 = vadd.f32 %v751_v21, %v690_v43  ;;  %v603_v21 = vadd.f32 %v2006_v17, %v1998_v59 }
 0x154   : > { %v1391_v23 = vpop.f32.mrf.mxu1  ;;  %v1411_v24 = vpop.f32.mrf.mxu0 }
 0x155   : > { %v874_v29 = vadd.f32 %v851_v14, %v774_v46  ;;  %v695_v17 = vadd.f32 %v2004_v10, %v603_v21 }
 0x156   : > { %v754_v0 = vpop.f32.mrf.mxu1  ;;  %v2008_v25 = vpop.f32.mrf.mxu0 }
 0x157   : > { %v775_v57 = vadd.f32 %v754_v0, %v691_v52 }
 0x158   : > { %v1392_v26 = vpop.f32.mrf.mxu1  ;;  %v1412_v27 = vpop.f32.mrf.mxu0 }
 0x159   : > { %v875_v4 = vadd.f32 %v854_v18, %v775_v57 }
 0x15a   : > { %v759_v28 = vpop.f32.mrf.mxu1  ;;  %v2010_v30 = vpop.f32.mrf.mxu0 }
 0x15b   : > { %v776_v41 = vadd.f32 %v759_v28, %v692_v63 }
 0x15c   : > { %v1395_v31 = vpop.f32.mrf.mxu1  ;;  %v1415_v32 = vpop.f32.mrf.mxu0 }
 0x15d   : > { %v876_v53 = vadd.f32 %v859_v22, %v776_v41 }
 0x15e   : > { %v762_v33 = vpop.f32.mrf.mxu1  ;;  %v2012_v34 = vpop.f32.mrf.mxu0 }
 0x15f   : > { %v777_v15 = vadd.f32 %v762_v33, %v693_v8 }
 0x160   : > { %v1396_v37 = vpop.f32.mrf.mxu1  ;;  %v1416_v38 = vpop.f32.mrf.mxu0 }
 0x161   : > { %v877_v28 = vadd.f32 %v2008_v25, %v777_v15 }
 0x162   : > { %v767_v39 = vpop.f32.mrf.mxu1  ;;  %v1027_v40 = vpop.f32.mrf.mxu0 }
 0x163   : > { %v778_v27 = vadd.f32 %v767_v39, %v694_v13 }
 0x164   : > { %v1399_v44 = vpop.f32.mrf.mxu1  ;;  %v1439_v45 = vpop.f32.mrf.mxu0 }
 0x165   : > { %v878_v25 = vadd.f32 %v2010_v30, %v778_v27 }
 0x166   : > { %v770_v48 = vpop.f32.mrf.mxu1  ;;  %v1030_v50 = vpop.f32.mrf.mxu0 }
 0x167   : > { %v779_v39 = vadd.f32 %v770_v48, %v695_v17 }
 0x168   : > { %v1400_v54 = vpop.f32.mrf.mxu1  ;;  %v1440_v56 = vpop.f32.mrf.mxu0 }
 0x169   : > { %v879_v51 = vadd.f32 %v2012_v34, %v779_v39 }
 0x16a   : > { %v943_v58 = vpop.f32.mrf.mxu1  ;;  %v1035_v60 = vpop.f32.mrf.mxu0 }
 0x16b   : > { %v966_v35 = vadd.f32 %v943_v58, %v874_v29 }
 0x16c   : > { %v1423_v1 = vpop.f32.mrf.mxu1  ;;  %v1443_v3 = vpop.f32.mrf.mxu0 }
 0x16d   : > { %v1050_v55 = vadd.f32 %v1027_v40, %v966_v35 }
 0x16e   : > { %v946_v47 = vpop.f32.mrf.mxu1  ;;  %v1038_v61 = vpop.f32.mrf.mxu0 }
 0x16f   : > { %v1063_v9 = vmul.f32 %v2021_v49, %v1050_v55  ;;  %v967_v11 = vadd.f32 %v946_v47, %v875_v4 }
 0x170   : > { %v1424_v12 = vpop.f32.mrf.mxu1  ;;  %v1444_v14 = vpop.f32.mrf.mxu0 }
 0x171   : > { %v1076_v16 = vadd.f32 %v2028_v7, %v1063_v9  ;;  %v1051_v18 = vadd.f32 %v1030_v50, %v967_v11 }
 0x172   : > { %v951_v19 = vpop.f32.mrf.mxu1  ;;  %v1043_v20 = vpop.f32.mrf.mxu0 }
 0x173   : > { %v1082_v23 = vmax.f32 %v1076_v16, 0.0  ;;  %v1064_v2 = vmul.f32 %v2021_v49, %v1051_v18  ;;  %v968_v24 = vadd.f32 %v951_v19, %v876_v53 }
 0x174   : > { %v1427_v0 = vpop.f32.mrf.mxu1  ;;  %v1447_v26 = vpop.f32.mrf.mxu0 }
 0x175   : > { %1089 = vst.msk [vmem:[%s2037_s26] sm:$0xff] %vm1088_vm2, %v1082_v23  ;;  %v1077_v6 = vadd.f32 %v2028_v7, %v1064_v2  ;;  %v1052_v22 = vadd.f32 %v1035_v60, %v968_v24 }
 0x176   : > { %v954_v31 = vpop.f32.mrf.mxu1  ;;  %v1046_v59 = vpop.f32.mrf.mxu0 }
 0x177   : > { %v1083_v32 = vmax.f32 %v1077_v6, 0.0  ;;  %v1065_v33 = vmul.f32 %v2021_v49, %v1052_v22  ;;  %v969_v36 = vadd.f32 %v954_v31, %v877_v28 }
 0x178   : > { %v1428_v37 = vpop.f32.mrf.mxu1  ;;  %v1448_v38 = vpop.f32.mrf.mxu0 }
 0x179   : > { %1090 = vst.msk [vmem:[%s2037_s26 + $0x8] sm:$0xff] %vm1088_vm2, %v1083_v32  ;;  %v1078_v40 = vadd.f32 %v2028_v7, %v1065_v33  ;;  %v1053_v42 = vadd.f32 %v1038_v61, %v969_v36 }
 0x17a   : > { %v959_v43 = vpop.f32.mrf.mxu1 }
 0x17b   : > { %v1084_v44 = vmax.f32 %v1078_v40, 0.0  ;;  %v1066_v10 = vmul.f32 %v2021_v49, %v1053_v42  ;;  %v970_v45 = vadd.f32 %v959_v43, %v878_v25 }
 0x17c   : > { %v1431_v46 = vpop.f32.mrf.mxu1 }
 0x17d   : > { %1091 = vst.msk [vmem:[%s2037_s26 + $0x10] sm:$0xff] %vm1088_vm2, %v1084_v44  ;;  %v1079_v48 = vadd.f32 %v2028_v7, %v1066_v10  ;;  %v1054_v50 = vadd.f32 %v1043_v20, %v970_v45 }
 0x17e   : > { %v962_v52 = vpop.f32.mrf.mxu1 }
 0x17f   : > { %v1085_v54 = vmax.f32 %v1079_v48, 0.0  ;;  %v1067_v30 = vmul.f32 %v2021_v49, %v1054_v50  ;;  %v971_v56 = vadd.f32 %v962_v52, %v879_v51 }
 0x180   : > { %v1432_v57 = vpop.f32.mrf.mxu1 }
 0x181   : > { %1092 = vst.msk [vmem:[%s2037_s26 + $0x18] sm:$0xff] %vm1088_vm2, %v1085_v54  ;;  %v1080_v29 = vadd.f32 %v2028_v7, %v1067_v30  ;;  %v1055_v58 = vadd.f32 %v1046_v59, %v971_v56 }
 0x183   : > { %v1086_v60 = vmax.f32 %v1080_v29, 0.0  ;;  %v1068_v62 = vmul.f32 %v2021_v49, %v1055_v58 }
 0x185   : > { %1093 = vst.msk [vmem:[%s2037_s26 + $0x20] sm:$0xff] %vm1088_vm2, %v1086_v60  ;;  %v1081_v34 = vadd.f32 %v2028_v7, %v1068_v62 }
 0x187   : > { %v1087_v63 = vmax.f32 %v1081_v34, 0.0 }
 0x189   : > { %1094 = vst.msk [vmem:[%s2037_s26 + $0x28] sm:$0xff] %vm1088_vm2, %v1087_v63 }
 0x18a   : > { %1610 = shalt.err (!%p1607_p0)
}
 0x18b   : > { %s1611_s13 = scalar_lea.hbm %s2067_s20, 768  ;;  %s1615_s5 = scalar_lea.hbm %s2118_s4, 1536 }
 0x18c   : > { %p1612_p5 = scmp.ne.s32.totalorder %s2067_s20, %s1611_s13  ;;  %p1616_p4 = scmp.lt.s32.totalorder %s2067_s20, %s2118_s4 }
 0x18d   : > { %p1617_p6 = scmp.lt.s32.totalorder %s1615_s5, %s1611_s13 }
 0x18e   : > { %p1613_p2 = pnand %p1612_p5, %p2134_p11 }
 0x18f   : > { %p1618_p8 = por %p1617_p6, %p1616_p4 }
 0x190   : > { %p1614_p1 = pneg %p1613_p2 }
 0x192   : > { %p1619_p3 = pnand %p1618_p8, %p1614_p1 }
 0x194   : > { %1622 = shalt.err (!%p1619_p3)
}
 0x195   : > { %s1674_s26 = smov 128   ;;  %s1675_s28 = smov 8  }
 0x196   : > { %1461 = dma.vmem_to_hbm [thread:$0]  (%p2134_p11), %s2069_s29, 768, %s2067_s20, %s1096_s19, %s1674_s26, %s1674_s26, %s1675_s28  }
 0x197 PF: > { %s1124_s14 = sand.u32 1, %s1653_s15   ;;  %p2135_p7 = scmp.ne.s32.totalorder %s2124_s22, 0 }
 0x198   : > { %p2136_p9 = scmp.ge.s32.totalorder %s1665_s18, 2  ;;  %s1125_s11 = scalar_lea.sflag [#allocation4], %s1124_s14 }
 0x19a   : > { %p1472_p10 = pnand %p2136_p9, %p2135_p7 }
 0x19c   : > { %p1473_p12 = pneg %p1472_p10 }
 0x19e   : > { %1648 = dma.done.wait (%p1473_p12), %s1125_s11, 768  }
 0x19f   : > { %1650 = vsyncadd (%p1473_p12), %s1125_s11, 4294966528  ;;  %p18_p13 = scmp.ge.s32.totalorder %s1755_s27, 4   ;;  %s2137_s15 = smov %s1657_s16 }
 0x1a0   : > { %s2138_s16 = smov %s1661_s17  ;;  %s2139_s17 = smov %s1775_s9 }
 0x1a1   : > { %s2140_s18 = smov %s1755_s27  ;;  %20 = sbr.rel (!%p18_p13) target bundleno = 6 (0x6), region = 93 }
 0x1a6   :  { %1130 = vsyncpa [#allocation3], 1 }
 0x1a7   :  { %1132 = vsyncpa [#allocation3 + $0x1], 1 }
 0x1a8   :  { %1133 = vsyncpa [#allocation6], 1 }
 0x1a9   :  { %1134 = vsyncpa [#allocation4], 1 }
 0x1aa   :  { %1136 = vsyncpa [#allocation4 + $0x1], 1 }

</bundles_post_ra>
